<compile_context>
chip_gen: v5e
topology: v5e:2x2
jax: 0.10.0
libtpu: 0.0.40
codegen_flags: <defaults>
</compile_context>

<pallas_src>
import math

import jax
import jax.numpy as jnp
from jax import lax
from jax.experimental import pallas as pl
from jax.experimental.pallas import tpu as pltpu


# ----------------------------------------------------------------------------
# Kernel 1: elementwise errors (tiled along pixel axis, megacore-parallel)
# ----------------------------------------------------------------------------
def _errors_kernel(x_ref, t_ref, neg_err_ref, fg_ref):
    x = x_ref[...]                               # [B, TILE] raw scores
    t = t_ref[...]                               # [B, TILE] labels
    p = 1.0 / (1.0 + jnp.exp(-x))                # sigmoid (EUP)
    fg = (t == 1.0).astype(jnp.float32)          # foreground mask for class 1
    neg_err_ref[...] = -jnp.abs(fg - p)          # negated -> ascending sort key
    fg_ref[...] = fg.astype(jnp.bfloat16)        # exact 0/1, feeds bf16 MXU later


# ----------------------------------------------------------------------------
# Kernel 2: per-image Lovasz loss on sorted (error, fg) pairs
# ----------------------------------------------------------------------------
def _lovasz_kernel(neg_err_ref, fg_ref, out_ref):
    neg_errs = neg_err_ref[0, :, :]              # [NB, T] f32 (ascending)
    errs = -neg_errs                             # errors, descending
    fg_bf = fg_ref[0, :, :]                      # [NB, T] bf16 in {0, 1}
    NB, T = errs.shape

    # Intra-block inclusive cumsum: fg @ triu(ones(T, T)); operator generated
    # in-kernel from iotas (no HBM constants), bf16 operands + f32 accumulation
    # (exact for 0/1 data, native MXU path).
    r = lax.broadcasted_iota(jnp.int32, (T, T), 0)
    c = lax.broadcasted_iota(jnp.int32, (T, T), 1)
    triu = (r <= c).astype(jnp.bfloat16)
    cfg = jnp.dot(fg_bf, triu, preferred_element_type=jnp.float32)      # [NB, T]

    # Cross-block exclusive offsets: tiny strict-lower-triangular matmul.
    rr = lax.broadcasted_iota(jnp.int32, (NB, NB), 0)
    cc = lax.broadcasted_iota(jnp.int32, (NB, NB), 1)
    strict_lower = (cc < rr).astype(jnp.bfloat16)
    blk_tot = cfg[:, T - 1:T].astype(jnp.bfloat16)   # [NB, 1]; integers <= T <= 256 -> exact bf16
    off = jnp.dot(strict_lower, blk_tot, preferred_element_type=jnp.float32)  # [NB, 1]
    cfg = cfg + off                              # full cumsum(fg) in sorted pixel order

    fg32 = fg_bf.astype(jnp.float32)
    gts = jnp.sum(fg32)                          # total foreground count (scalar)

    blk = lax.broadcasted_iota(jnp.int32, (NB, T), 0)
    lane = lax.broadcasted_iota(jnp.int32, (NB, T), 1)
    idx = (blk * T + lane + 1).astype(jnp.float32)   # 1-based flattened position

    # jaccard at position i and (analytically) at position i-1; the first
    # difference replaces the old P x P diff-matrix matmul with pure VPU work.
    jac = 1.0 - (gts - cfg) / (gts + idx - cfg)
    cfg_p = cfg - fg32                           # cumsum at previous position (exact int)
    idx_p = idx - 1.0
    prev = 1.0 - (gts - cfg_p) / (gts + idx_p - cfg_p)
    prev = jnp.where(idx == 1.0, 0.0, prev)      # grad[0] = jac[0]
    grad = jac - prev

    loss = jnp.sum(errs * grad)                  # dot(errors_sorted, lovasz_grad)
    out_ref[...] = jnp.broadcast_to(loss, out_ref.shape).astype(jnp.float32)


# ----------------------------------------------------------------------------
# Wrapper
# ----------------------------------------------------------------------------
def _pick_pixel_tile(P):
    for t in (2048, 1024, 512, 256, 128):
        if P % t == 0:
            return t
    return P


def _pick_cumsum_tile(P):
    t = int(math.ceil(math.sqrt(P) / 128.0)) * 128
    return max(128, min(256, t))   # 128-aligned; <=256 keeps block totals exact in bf16


def lovasz_seg_loss(scores, target):
    """Forward of LovaszSegLoss(classes=[1], per_image=True)."""
    B, C, H, W = scores.shape
    assert C == 1, "sigmoid / single-class Lovasz expects C == 1"
    P = H * W
    x2d = scores.reshape(B, P).astype(jnp.float32)
    t2d = target.reshape(B, P).astype(jnp.float32)

    # ---- kernel 1: tiled elementwise pass -----------------------------------
    TILE = _pick_pixel_tile(P)
    neg_err, fg = pl.pallas_call(
        _errors_kernel,
        grid=(P // TILE,),
        in_specs=[pl.BlockSpec((B, TILE), lambda i: (0, i)),
                  pl.BlockSpec((B, TILE), lambda i: (0, i))],
        out_specs=(pl.BlockSpec((B, TILE), lambda i: (0, i)),
                   pl.BlockSpec((B, TILE), lambda i: (0, i))),
        out_shape=(jax.ShapeDtypeStruct((B, P), jnp.float32),
                   jax.ShapeDtypeStruct((B, P), jnp.bfloat16)),
        compiler_params=pltpu.CompilerParams(dimension_semantics=("parallel",)),
    )(x2d, t2d)

    # ---- XLA glue: single fused sort (key = -error, payload = fg bf16) ------
    neg_sorted, fg_sorted = lax.sort((neg_err, fg), dimension=1,
                                     num_keys=1, is_stable=False)

    # Pad to a multiple of the cumsum block; zero error / zero fg pads at the
    # end keep the descending order and contribute exactly zero to the loss.
    T = _pick_cumsum_tile(P)
    NB = -(-P // T)
    P_pad = NB * T
    if P_pad != P:
        neg_sorted = jnp.pad(neg_sorted, ((0, 0), (0, P_pad - P)))
        fg_sorted = jnp.pad(fg_sorted, ((0, 0), (0, P_pad - P)))
    neg3 = neg_sorted.reshape(B, NB, T)
    fg3 = fg_sorted.reshape(B, NB, T)

    # ---- kernel 2: per-image Lovasz loss (grid over images, megacore) -------
    per_img = pl.pallas_call(
        _lovasz_kernel,
        grid=(B,),
        in_specs=[pl.BlockSpec((1, NB, T), lambda b: (b, 0, 0)),
                  pl.BlockSpec((1, NB, T), lambda b: (b, 0, 0))],
        out_specs=pl.BlockSpec((1, 1, 128), lambda b: (b, 0, 0)),
        out_shape=jax.ShapeDtypeStruct((B, 1, 128), jnp.float32),
        compiler_params=pltpu.CompilerParams(dimension_semantics=("parallel",)),
    )(neg3, fg3)

    return jnp.mean(per_img[:, 0, 0])


# ----------------------------------------------------------------------------
# Pure-JAX reference (PyTorch semantics) for the sanity check
# ----------------------------------------------------------------------------
def _reference(scores, target):
    B, C, H, W = scores.shape
    P = H * W
    probas = jax.nn.sigmoid(scores.reshape(B, P))
    labels = target.reshape(B, P)
    fg = (labels == 1.0).astype(jnp.float32)
    errors = jnp.abs(fg - probas)
    order = jnp.argsort(-errors, axis=1)
    e_s = jnp.take_along_axis(errors, order, axis=1)
    fg_s = jnp.take_along_axis(fg, order, axis=1)
    gts = fg_s.sum(axis=1, keepdims=True)
    inter = gts - jnp.cumsum(fg_s, axis=1)
    union = gts + jnp.cumsum(1.0 - fg_s, axis=1)
    jac = 1.0 - inter / union
    grad = jnp.concatenate([jac[:, :1], jac[:, 1:] - jac[:, :-1]], axis=1)
    return jnp.mean(jnp.sum(e_s * grad, axis=1))


if __name__ == "__main__":
    key = jax.random.PRNGKey(0)
    k1, k2 = jax.random.split(key)
    B, C, H, W = 2, 1, 16, 16
    scores = jax.random.normal(k1, (B, C, H, W), dtype=jnp.float32)
    target = (jax.random.uniform(k2, (B, C, H, W)) > 0.5).astype(jnp.float32)

    loss = jax.block_until_ready(lovasz_seg_loss(scores, target))
    ref = _reference(scores, target)
    assert jnp.isfinite(loss)
    assert jnp.abs(loss - ref) < 1e-4, (float(loss), float(ref))
    print("KERNEL_OK")
</pallas_src>

<mosaic_0001>
module attributes {stable_mosaic.version = 11 : i64} {
  func.func @_errors_kernel(%arg0: i32, %arg1: memref<2x256xf32, #tpu.memory_space<vmem>>, %arg2: memref<2x256xf32, #tpu.memory_space<vmem>>, %arg3: memref<2x256xf32, #tpu.memory_space<vmem>>, %arg4: memref<2x256xbf16, #tpu.memory_space<vmem>>) attributes {dimension_semantics = [#tpu.dimension_semantics<parallel>], iteration_bounds = array<i64: 1>, scalar_prefetch = 0 : i64, scratch_operands = 0 : i64, tpu.core_type = #tpu.core_type<tc>, window_params = [{transform_indices = @transform_0, window_bounds = array<i64: 2, 256>}, {transform_indices = @transform_1, window_bounds = array<i64: 2, 256>}, {transform_indices = @transform_2, window_bounds = array<i64: 2, 256>}, {transform_indices = @transform_3, window_bounds = array<i64: 2, 256>}]} {
    %c0 = arith.constant 0 : index
    %c0_0 = arith.constant 0 : index
    %0 = vector.load %arg1[%c0, %c0_0] : memref<2x256xf32, #tpu.memory_space<vmem>>, vector<2x256xf32>
    %c0_1 = arith.constant 0 : index
    %c0_2 = arith.constant 0 : index
    %1 = vector.load %arg2[%c0_1, %c0_2] : memref<2x256xf32, #tpu.memory_space<vmem>>, vector<2x256xf32>
    %cst = arith.constant 0.000000e+00 : f32
    %2 = vector.broadcast %cst : f32 to vector<2x256xf32>
    %3 = arith.subf %2, %0 : vector<2x256xf32>
    %4 = math.exp %3 : vector<2x256xf32>
    %cst_3 = arith.constant 1.000000e+00 : f32
    %5 = vector.broadcast %cst_3 : f32 to vector<2x256xf32>
    %6 = arith.addf %5, %4 : vector<2x256xf32>
    %cst_4 = arith.constant 1.000000e+00 : f32
    %7 = vector.broadcast %cst_4 : f32 to vector<2x256xf32>
    %8 = arith.divf %7, %6 : vector<2x256xf32>
    %cst_5 = arith.constant 1.000000e+00 : f32
    %9 = vector.broadcast %cst_5 : f32 to vector<2x256xf32>
    %10 = arith.cmpf oeq, %1, %9 : vector<2x256xf32>
    %11 = arith.extui %10 : vector<2x256xi1> to vector<2x256xi32>
    %12 = arith.sitofp %11 : vector<2x256xi32> to vector<2x256xf32>
    %13 = arith.subf %12, %8 : vector<2x256xf32>
    %14 = math.absf %13 : vector<2x256xf32>
    %cst_6 = arith.constant 0.000000e+00 : f32
    %15 = vector.broadcast %cst_6 : f32 to vector<2x256xf32>
    %16 = arith.subf %15, %14 : vector<2x256xf32>
    %c0_7 = arith.constant 0 : index
    %c0_8 = arith.constant 0 : index
    %17 = vector.load %arg3[%c0_7, %c0_8] : memref<2x256xf32, #tpu.memory_space<vmem>>, vector<2x256xf32>
    tpu.vector_store %arg3[%c0_7, %c0_8], %16 {strides = array<i32>} : memref<2x256xf32, #tpu.memory_space<vmem>>, vector<2x256xf32>,
    %18 = arith.truncf %12 : vector<2x256xf32> to vector<2x256xbf16>
    %c0_9 = arith.constant 0 : index
    %c0_10 = arith.constant 0 : index
    %19 = vector.load %arg4[%c0_9, %c0_10] : memref<2x256xbf16, #tpu.memory_space<vmem>>, vector<2x256xbf16>
    tpu.vector_store %arg4[%c0_9, %c0_10], %18 {strides = array<i32>} : memref<2x256xbf16, #tpu.memory_space<vmem>>, vector<2x256xbf16>,
    return
  }
  func.func @transform_0(%arg0: i32) -> (i32, i32) {
    %c0_i32 = arith.constant 0 : i32
    %c0_i32_0 = arith.constant 0 : i32
    return %c0_i32, %arg0 : i32, i32
  }
  func.func @transform_1(%arg0: i32) -> (i32, i32) {
    %c0_i32 = arith.constant 0 : i32
    %c0_i32_0 = arith.constant 0 : i32
    return %c0_i32, %arg0 : i32, i32
  }
  func.func @transform_2(%arg0: i32) -> (i32, i32) {
    %c0_i32 = arith.constant 0 : i32
    %c0_i32_0 = arith.constant 0 : i32
    return %c0_i32, %arg0 : i32, i32
  }
  func.func @transform_3(%arg0: i32) -> (i32, i32) {
    %c0_i32 = arith.constant 0 : i32
    %c0_i32_0 = arith.constant 0 : i32
    return %c0_i32, %arg0 : i32, i32
  }
}

</mosaic_0001>

<bundles_post_ra>
// kernel: tpu_custom_call.1
= control target key start
LH: loop header
LB: loop body
LE: loop exit
PB: predicated region body
PF: predicated region fallthrough
CT: control target
= control target key end

     0   :  { %9 = vsyncpa [#allocation3], 0  ;;  %s271_s0 = inlined_call_operand.hbm [shape: f32[2,256], index: 0, kind: input, shape index: {}]   ;;  %s272_s1 = inlined_call_operand.hbm [shape: f32[2,256], index: 1, kind: input, shape index: {}]   ;;  %s273_s2 = inlined_call_operand.hbm [shape: f32[2,256], index: 2, kind: output, shape index: {0}]   ;;  %s274_s3 = inlined_call_operand.hbm [shape: bf16[2,256], index: 3, kind: output, shape index: {1}]  }
   0x1   :  { %10 = vsyncpa [#allocation6], 0 }
   0x2   :  { %11 = vsyncpa [#allocation4], 0 }
   0x3   :  { %12 = vsyncpa [#allocation9], 0  ;;  %s18_s14 = sshll.u32 %s271_s0, 4  ;;  %s234_s15 = smov [#allocation2]   ;;  %s19_s14 = int_to_ptr.hbm [resolvable:$true] %s18_s14 }
   0x4   :  { %s20_s16 = sshll.u32 %s234_s15, 4  ;;  %s29_s19 = sshll.u32 %s272_s1, 4  ;;  %s21_s16 = int_to_ptr.vmem [resolvable:$true] %s20_s16  ;;  %s30_s19 = int_to_ptr.hbm [resolvable:$true] %s29_s19 }
   0x5   :  { %23 = dma.hbm_to_vmem [thread:$0]  %s19_s14, 64, %s21_s16, [#allocation3]  }
   0x6   :  { %s235_s20 = smov [#allocation5]  }
   0x7   :  { %s31_s21 = sshll.u32 %s235_s20, 4  ;;  %s32_s21 = int_to_ptr.vmem [resolvable:$true] %s31_s21 }
   0x8   :  { %34 = dma.hbm_to_vmem [thread:$0]  %s30_s19, 64, %s32_s21, [#allocation6]  }
   0x9   :  { %226 = dma.done.wait [#allocation3], 64  }
   0xa   :  { %227 = vsyncadd [#allocation3], 4294967232 }
   0xb   :  { %228 = dma.done.wait [#allocation6], 64  }
   0xc   :  { %229 = vsyncadd [#allocation6], 4294967232  ;;  %v43_v0 = vld [vmem:[#allocation2] sm:$0xf]  ;;  %v44_v1 = vld [vmem:[#allocation5] sm:$0xf] }
   0xd   :  { %v45_v2 = vsub.f32 0.0, %v43_v0  ;;  %vm64_vm0 = vcmp.eq.f32.partialorder %v44_v1, 1.0  ;;  %v236_v3 = vmov 0.0   ;;  %s237_s0 = smov [#allocation8]   ;;  %s104_s24 = sshll.u32 %s274_s3, 4  ;;  %vm80_vm1 = vcmask 1040384   ;;  %s105_s24 = int_to_ptr.hbm [resolvable:$true] %s104_s24 }
   0xe   :  { %v120_v4 = vsel %vm64_vm0, 1.0, %v236_v3  ;;  %s102_s1 = sshll.u32 %s237_s0, 4  ;;  %s238_s3 = smov [#allocation7]   ;;  %s103_s1 = int_to_ptr.vmem [resolvable:$true] %s102_s1 }
   0xf   :  { %v46_v5 = vmul.f32 1.442695, %v45_v2  ;;  %72 = vst [vmem:[#allocation1] ss:$4 sm:$0xff] %v120_v4  ;;  %s91_s25 = sshll.u32 %s238_s3, 4  ;;  %s93_s28 = sshll.u32 %s273_s2, 4  ;;  %s92_s25 = int_to_ptr.vmem [resolvable:$true] %s91_s25  ;;  %s94_s28 = int_to_ptr.hbm [resolvable:$true] %s93_s28 }
  0x11   :  { %126 = vpow2.f32 %v46_v5 }
  0x16   :  { %v73_v6 = vld.sshfl [vmem:[#allocation1] sm:$0xff pattern:$0x73625140]  ;;  %v74_v7 = vld.sshfl [vmem:[#allocation1 + $0x8] sm:$0xff pattern:$0x73625140] }
  0x17   :  { %v127_v8 = vpop.eup %126  ;;  %v77_v9 = vpack.c.bf16 %v74_v7, %v73_v6 }
  0x18   :  { %v48_v10 = vadd.f32 1.0, %v127_v8 }
  0x19   :  { %v79_v11 = vrot.slane %v77_v9, 3 }
  0x1a   :  { %128 = vrcp.f32 %v48_v10  ;;  %v60_v15 = vand.u32 2147483648, %v48_v10  ;;  %vm54_vm2 = vweird.f32 %v48_v10  ;;  %v58_v17 = vand.u32 2147483647, %v48_v10 }
  0x1b   :  { %v83_v12 = vsel %vm80_vm1, %v77_v9, %v79_v11 }
  0x1c   :  { %85 = vst [vmem:[#allocation8] sm:$0x3] %v83_v12  ;;  %v61_v19 = vor.u32 1.1754944e-38, %v60_v15  ;;  %vm59_vm5 = vcmp.eq.f32.partialorder %v58_v17, 8.507059e+37 }
  0x1d   :  { %107 = dma.vmem_to_hbm [thread:$0]  %s103_s1, 32, %s105_s24, [#allocation9]  }
  0x20   :  { %v129_v13 = vpop.eup %128 }
  0x21   :  { %v50_v14 = vmul.f32 %v129_v13, %v48_v10  ;;  %vm55_vm3 = vweird.f32 %v129_v13 }
  0x22   :  { %vm56_vm4 = vmor %vm54_vm2, %vm55_vm3 }
  0x23   :  { %v51_v16 = vsub.f32 1.0, %v50_v14 }
  0x25   :  { %v52_v18 = vmul.f32 %v129_v13, %v51_v16 }
  0x27   :  { %v53_v20 = vadd.f32 %v129_v13, %v52_v18 }
  0x29   :  { %v57_v21 = vsel %vm56_vm4, %v129_v13, %v53_v20 }
  0x2a   :  { %v62_v22 = vsel %vm59_vm5, %v61_v19, %v57_v21 }
  0x2b   :  { %v67_v23 = vsub.f32 %v120_v4, %v62_v22 }
  0x2d   :  { %v68_v24 = vand.u32 2147483647, %v67_v23 }
  0x2f   :  { %v69_v25 = vsub.f32 0.0, %v68_v24 }
  0x31   :  { %70 = vst [vmem:[#allocation7] sm:$0xf] %v69_v25 }
  0x32   :  { %96 = dma.vmem_to_hbm [thread:$0]  %s92_s25, 64, %s94_s28, [#allocation4]  }
  0x33   :  { %230 = dma.done.wait [#allocation4], 64  }
  0x34   :  { %231 = vsyncadd [#allocation4], 4294967232 }
  0x35   :  { %232 = dma.done.wait [#allocation9], 32  }
  0x36   :  { %233 = vsyncadd [#allocation9], 4294967264 }
  0x37   :  { %116 = vsyncpa [#allocation3], 1 }
  0x38   :  { %117 = vsyncpa [#allocation6], 1 }
  0x39   :  { %118 = vsyncpa [#allocation4], 1 }
  0x3a   :  { %119 = vsyncpa [#allocation9], 1 }

</bundles_post_ra>
